<compile_context>
chip_gen: v5e
topology: v5e:2x2
jax: 0.10.0
libtpu: 0.0.40
codegen_flags: <defaults>
</compile_context>

<pallas_src>
import functools

import jax
import jax.numpy as jnp
from jax.experimental import pallas as pl
from jax.experimental.pallas import tpu as pltpu


def _avgpool3d_kernel(x_ref, p_ref, o_ref, *, split_depth):
    """One grid step over TILE_R pooling row-groups.

    x_ref: (TILE_R, 2*H*W)  -- one row per (n, c, output-depth) group.
    p_ref: (H*W, Ho*Wo)     -- bf16 pooling matrix (split_depth=True), or
           (2*H*W, Ho*Wo)   -- stacked variant that also folds the depth sum.
    o_ref: (TILE_R, Ho*Wo)
    """
    if split_depth:
        hw = p_ref.shape[0]
        # Depth-pair sum in f32 (exact), then a single bf16 rounding for MXU.
        xs = (x_ref[:, pl.ds(0, hw)].astype(jnp.float32)
              + x_ref[:, pl.ds(hw, hw)].astype(jnp.float32)).astype(jnp.bfloat16)
    else:
        # Depth sum folded into the stacked pooling matrix (K = 2*H*W), so no
        # lane-misaligned slicing is needed when H*W % 128 != 0.
        xs = x_ref[...].astype(jnp.bfloat16)
    y = jnp.dot(xs, p_ref[...], preferred_element_type=jnp.float32)
    o_ref[...] = y.astype(o_ref.dtype)


def _pool_matrix(ho, wo, stacked, dtype=jnp.bfloat16):
    """Pooling matrix: column (yo*Wo + xo) sums its 2x2 spatial window * 1/8.

    Shape (H*W, Ho*Wo), or (2*H*W, Ho*Wo) when `stacked` (depth sum folded in).
    The full 1/(2*2*2) AvgPool3d scale lives here; 0 and 0.125 are exact bf16.
    """
    h = jnp.arange(2 * ho)
    w = jnp.arange(2 * wo)
    cols = (h[:, None] // 2) * wo + (w[None, :] // 2)             # (H, W)
    p = jax.nn.one_hot(cols.reshape(-1), ho * wo, dtype=dtype)    # (H*W, Ho*Wo)
    p = p * jnp.asarray(0.125, dtype)
    if stacked:
        p = jnp.concatenate([p, p], axis=0)                       # (2*H*W, Ho*Wo)
    return p


def _reference_avgpool3d(x):
    """Pure-JAX AvgPool3d(2, 2) for an even-cropped NCDHW array."""
    N, C, D, H, W = x.shape
    xr = x.reshape(N, C, D // 2, 2, H // 2, 2, W // 2, 2)
    return xr.mean(axis=(3, 5, 7)).astype(x.dtype)


def _vmem_capacity_bytes():
    """Best-effort per-core VMEM capacity; conservative 64 MiB if unknown."""
    try:
        info = pltpu.get_tpu_info()
        for name in ("vmem_capacity_bytes", "vmem_size_bytes", "vmem_bytes"):
            v = getattr(info, name, None)
            if isinstance(v, int) and (16 << 20) <= v <= (1 << 30):
                return v
    except Exception:
        pass
    try:
        kind = jax.devices()[0].device_kind.lower()
        if "v7" in kind or "7x" in kind:
            return 64 << 20
        if "v5" in kind or "v6" in kind or "trillium" in kind:
            return 128 << 20
    except Exception:
        pass
    return 64 << 20


def _round_up(x, m):
    return ((x + m - 1) // m) * m


def _choose_tile_rows(num_rows, row_bytes, max_block_bytes, sublane_multiple):
    """Rows per block: as many as fit the byte cap (sublane-aligned), with at
    least 2 grid steps so the single parallel axis feeds both v7x cores."""
    if num_rows <= sublane_multiple:
        return num_rows
    t = max(max_block_bytes // max(row_bytes, 1), 1)
    t = max((t // sublane_multiple) * sublane_multiple, sublane_multiple)
    t = min(t, _round_up(num_rows, sublane_multiple))
    if pl.cdiv(num_rows, t) < 2:
        t = max(_round_up(pl.cdiv(num_rows, 2), sublane_multiple),
                sublane_multiple)
    return t


def encoder_forward(x):
    """Encoder.forward(x) == nn.AvgPool3d(kernel_size=2, stride=2)(x).

    x: (N, C, D, H, W); returns (N, C, D//2, H//2, W//2) in x.dtype.
    """
    N, C, D, H, W = x.shape
    Do, Ho, Wo = D // 2, H // 2, W // 2
    if Do == 0 or Ho == 0 or Wo == 0:
        return jnp.zeros((N, C, Do, Ho, Wo), x.dtype)

    # AvgPool3d(2, 2) floors odd trailing dims: crop (no-op when already even).
    x = x[:, :, : 2 * Do, : 2 * Ho, : 2 * Wo]
    H, W = 2 * Ho, 2 * Wo
    hw = H * W
    n_out = Ho * Wo
    R = N * C * Do

    vmem_cap = _vmem_capacity_bytes()
    small_vmem = vmem_cap <= (64 << 20)                 # v7x-class budget
    max_block_bytes = (8 << 20) if small_vmem else (16 << 20)

    # Depth-pair handling: lane-aligned split + VPU add when each plane's
    # flattened length is a lane multiple; otherwise stack the pooling matrix.
    split_depth = (hw % 128 == 0)
    p_rows = hw if split_depth else 2 * hw
    p_bytes = p_rows * n_out * 2                        # bf16
    p_budget = (6 << 20) if small_vmem else (12 << 20)
    if p_bytes > p_budget:
        # TODO(synk): implement separable pooling (lane-axis W matmul + H/D
        # sublane-pair sums) so the constant matrix stays O(W*Wo) and very
        # large spatial dims remain in the Pallas path; until then use XLA
        # instead of blowing up VMEM / failing to compile.
        return _reference_avgpool3d(x)

    xr = x.reshape(R, 2 * hw)                           # free, contiguous view
    p = _pool_matrix(Ho, Wo, stacked=not split_depth)

    itemsize = jnp.dtype(x.dtype).itemsize
    sub = {1: 32, 2: 16}.get(itemsize, 8)               # sublane packing multiple
    tile_r = _choose_tile_rows(R, 2 * hw * itemsize, max_block_bytes, sub)
    grid = (pl.cdiv(R, tile_r),)                        # ragged last block OK

    in_blk = tile_r * 2 * hw * itemsize
    out_blk = tile_r * n_out * itemsize
    # f32 depth-sum + bf16 matmul operand + (lane-padded) f32 matmul result.
    tmp_bytes = (tile_r * hw * 4 + tile_r * 2 * hw * 2
                 + tile_r * max(n_out, 128) * 4)
    vmem_limit = 2 * (in_blk + out_blk) + 2 * p_bytes + tmp_bytes + (4 << 20)
    vmem_limit = max(vmem_limit, 32 << 20)
    vmem_limit = min(vmem_limit, int(vmem_cap * 0.9))

    kernel = functools.partial(_avgpool3d_kernel, split_depth=split_depth)

    def build(single_buffer_p):
        if single_buffer_p:
            # Constant block (index map (0,0) every step): a second pipeline
            # buffer would never be used, so keep only one copy in VMEM.
            p_spec = pl.BlockSpec((p_rows, n_out), lambda i: (0, 0),
                                  pipeline_mode=pl.Buffered(1))
        else:
            p_spec = pl.BlockSpec((p_rows, n_out), lambda i: (0, 0))
        return pl.pallas_call(
            kernel,
            out_shape=jax.ShapeDtypeStruct((R, n_out), x.dtype),
            grid_spec=pltpu.PrefetchScalarGridSpec(
                num_scalar_prefetch=0,
                grid=grid,
                in_specs=[
                    # lane-dense input slab: tile_r rows of 2*H*W elements
                    pl.BlockSpec((tile_r, 2 * hw), lambda i: (i, 0)),
                    p_spec,
                ],
                out_specs=pl.BlockSpec((tile_r, n_out), lambda i: (i, 0)),
            ),
            compiler_params=pltpu.CompilerParams(
                dimension_semantics=("parallel",),
                vmem_limit_bytes=vmem_limit,
            ),
        )

    try:
        out = build(True)(xr, p)
    except Exception:
        # Some jax versions may reject a single-buffered pipeline_mode; the
        # double-buffered constant block only costs a little extra VMEM.
        out = build(False)(xr, p)

    return out.reshape(N, C, Do, Ho, Wo)


if __name__ == "__main__":
    key = jax.random.PRNGKey(0)
    k1, k2, k3 = jax.random.split(key, 3)

    # 1) Canonical shape: f32, even dims, lane-aligned depth-split path.
    x1 = jax.random.normal(k1, (2, 4, 8, 16, 16), dtype=jnp.float32)
    y1 = jax.block_until_ready(encoder_forward(x1))
    r1 = _reference_avgpool3d(x1)
    assert y1.shape == (2, 4, 4, 8, 8), y1.shape
    assert jnp.allclose(y1, r1, atol=1e-2, rtol=1e-2), "mismatch (test 1)"

    # 2) Odd trailing dims (cropping), hw % 128 != 0 (stacked-P path) and a
    #    ragged final grid block (R = 12, tile_r = 8).
    x2 = jax.random.normal(k2, (2, 3, 5, 12, 13), dtype=jnp.float32)
    y2 = jax.block_until_ready(encoder_forward(x2))
    r2 = _reference_avgpool3d(x2[:, :, :4, :12, :12])
    assert y2.shape == (2, 3, 2, 6, 6), y2.shape
    assert jnp.allclose(y2, r2, atol=1e-2, rtol=1e-2), "mismatch (test 2)"

    # 3) bf16 input.
    x3 = jax.random.normal(k3, (1, 2, 4, 16, 16), dtype=jnp.bfloat16)
    y3 = jax.block_until_ready(encoder_forward(x3))
    r3 = _reference_avgpool3d(x3.astype(jnp.float32)).astype(jnp.bfloat16)
    assert y3.shape == (1, 2, 2, 8, 8), y3.shape
    assert jnp.allclose(y3.astype(jnp.float32), r3.astype(jnp.float32),
                        atol=3e-2, rtol=3e-2), "mismatch (test 3)"

    print("KERNEL_OK")
</pallas_src>

<mosaic_0001>
module attributes {stable_mosaic.version = 11 : i64} {
  func.func @_avgpool3d_kernel(%arg0: i32, %arg1: memref<16x512xf32, #tpu.memory_space<vmem>>, %arg2: memref<256x64xbf16, #tpu.memory_space<vmem>>, %arg3: memref<16x64xf32, #tpu.memory_space<vmem>>) attributes {dimension_semantics = [#tpu.dimension_semantics<parallel>], iteration_bounds = array<i64: 2>, scalar_prefetch = 0 : i64, scratch_operands = 0 : i64, tpu.core_type = #tpu.core_type<tc>, window_params = [{transform_indices = @transform_0, window_bounds = array<i64: 16, 512>}, {pipeline_mode = #tpu.pipeline_mode<synchronous>, transform_indices = @transform_1, window_bounds = array<i64: 256, 64>}, {transform_indices = @transform_2, window_bounds = array<i64: 16, 64>}]} {
    %c0 = arith.constant 0 : index
    %c0_0 = arith.constant 0 : index
    %0 = vector.load %arg1[%c0, %c0_0] : memref<16x512xf32, #tpu.memory_space<vmem>>, vector<16x256xf32>
    %c0_1 = arith.constant 0 : index
    %c256 = arith.constant 256 : index
    %1 = vector.load %arg1[%c0_1, %c256] : memref<16x512xf32, #tpu.memory_space<vmem>>, vector<16x256xf32>
    %2 = arith.addf %0, %1 : vector<16x256xf32>
    %3 = arith.truncf %2 : vector<16x256xf32> to vector<16x256xbf16>
    %c0_2 = arith.constant 0 : index
    %c0_3 = arith.constant 0 : index
    %4 = vector.load %arg2[%c0_2, %c0_3] : memref<256x64xbf16, #tpu.memory_space<vmem>>, vector<256x64xbf16>
    %cst = arith.constant dense<0.000000e+00> : vector<16x64xf32>
    %5 = tpu.matmul %3, %4, %cst {dimension_numbers = #tpu.dot_dimension_numbers<[1], [0], [0], [1], [0, 0, 1, 1], [], []>} : vector<16x256xbf16>, vector<256x64xbf16>, vector<16x64xf32> -> vector<16x64xf32>
    %c0_4 = arith.constant 0 : index
    %c0_5 = arith.constant 0 : index
    %6 = vector.load %arg3[%c0_4, %c0_5] : memref<16x64xf32, #tpu.memory_space<vmem>>, vector<16x64xf32>
    tpu.vector_store %arg3[%c0_4, %c0_5], %5 {strides = array<i32>} : memref<16x64xf32, #tpu.memory_space<vmem>>, vector<16x64xf32>,
    return
  }
  func.func @transform_0(%arg0: i32) -> (i32, i32) {
    %c0_i32 = arith.constant 0 : i32
    %c0_i32_0 = arith.constant 0 : i32
    return %arg0, %c0_i32 : i32, i32
  }
  func.func @transform_1(%arg0: i32) -> (i32, i32) {
    %c0_i32 = arith.constant 0 : i32
    %c0_i32_0 = arith.constant 0 : i32
    %c0_i32_1 = arith.constant 0 : i32
    return %c0_i32, %c0_i32_0 : i32, i32
  }
  func.func @transform_2(%arg0: i32) -> (i32, i32) {
    %c0_i32 = arith.constant 0 : i32
    %c0_i32_0 = arith.constant 0 : i32
    return %arg0, %c0_i32 : i32, i32
  }
}

module attributes {stable_mosaic.version = 11 : i64} {
  func.func @_avgpool3d_kernel(%arg0: i32, %arg1: memref<16x512xf32, #tpu.memory_space<vmem>>, %arg2: memref<256x64xbf16, #tpu.memory_space<vmem>>, %arg3: memref<16x64xf32, #tpu.memory_space<vmem>>) attributes {dimension_semantics = [#tpu.dimension_semantics<parallel>], iteration_bounds = array<i64: 2>, scalar_prefetch = 0 : i64, scratch_operands = 0 : i64, tpu.core_type = #tpu.core_type<tc>, window_params = [{transform_indices = @transform_0, window_bounds = array<i64: 16, 512>}, {pipeline_mode = #tpu.pipeline_mode<synchronous>, transform_indices = @transform_1, window_bounds = array<i64: 256, 64>}, {transform_indices = @transform_2, window_bounds = array<i64: 16, 64>}]} {
    %c0 = arith.constant 0 : index
    %c0_0 = arith.constant 0 : index
    %0 = vector.load %arg1[%c0, %c0_0] : memref<16x512xf32, #tpu.memory_space<vmem>>, vector<16x256xf32>
    %c0_1 = arith.constant 0 : index
    %c256 = arith.constant 256 : index
    %1 = vector.load %arg1[%c0_1, %c256] : memref<16x512xf32, #tpu.memory_space<vmem>>, vector<16x256xf32>
    %2 = arith.addf %0, %1 : vector<16x256xf32>
    %3 = arith.truncf %2 : vector<16x256xf32> to vector<16x256xbf16>
    %c0_2 = arith.constant 0 : index
    %c0_3 = arith.constant 0 : index
    %4 = vector.load %arg2[%c0_2, %c0_3] : memref<256x64xbf16, #tpu.memory_space<vmem>>, vector<256x64xbf16>
    %cst = arith.constant dense<0.000000e+00> : vector<16x64xf32>
    %5 = tpu.matmul %3, %4, %cst {dimension_numbers = #tpu.dot_dimension_numbers<[1], [0], [0], [1], [0, 0, 1, 1], [], []>} : vector<16x256xbf16>, vector<256x64xbf16>, vector<16x64xf32> -> vector<16x64xf32>
    %c0_4 = arith.constant 0 : index
    %c0_5 = arith.constant 0 : index
    %6 = vector.load %arg3[%c0_4, %c0_5] : memref<16x64xf32, #tpu.memory_space<vmem>>, vector<16x64xf32>
    tpu.vector_store %arg3[%c0_4, %c0_5], %5 {strides = array<i32>} : memref<16x64xf32, #tpu.memory_space<vmem>>, vector<16x64xf32>,
    return
  }
  func.func @transform_0(%arg0: i32) -> (i32, i32) {
    %c0_i32 = arith.constant 0 : i32
    %c0_i32_0 = arith.constant 0 : i32
    return %arg0, %c0_i32 : i32, i32
  }
  func.func @transform_1(%arg0: i32) -> (i32, i32) {
    %c0_i32 = arith.constant 0 : i32
    %c0_i32_0 = arith.constant 0 : i32
    %c0_i32_1 = arith.constant 0 : i32
    return %c0_i32, %c0_i32_0 : i32, i32
  }
  func.func @transform_2(%arg0: i32) -> (i32, i32) {
    %c0_i32 = arith.constant 0 : i32
    %c0_i32_0 = arith.constant 0 : i32
    return %arg0, %c0_i32 : i32, i32
  }
}

</mosaic_0001>

<bundles_post_ra>
// kernel: tpu_custom_call.1
= control target key start
LH: loop header
LB: loop body
LE: loop exit
PB: predicated region body
PF: predicated region fallthrough
CT: control target
= control target key end

     0   :  { %7 = vsyncpa [#allocation3], 0  ;;  %s748_s0 = inlined_call_operand.vmem [shape: f32[32,512], index: 0, kind: input, shape index: {}]   ;;  %s749_s1 = inlined_call_operand.vmem [shape: bf16[256,64], index: 1, kind: input, shape index: {}]   ;;  %s750_s2 = inlined_call_operand.hbm [shape: f32[32,64], index: 2, kind: output, shape index: {}]  }
   0x1   :  { %9 = vsyncpa [#allocation3 + $0x1], 0  ;;  %s616_s9 = smov 0   ;;  %s618_s10 = smov 0  }
   0x2   :  { %s620_s11 = smov 0   ;;  %s622_s12 = smov 0  }
   0x3 LB: > { %s637_s13 = sadd.s32 4294967295, %s597_s12   ;;  %s399_s14 = sadd.s32 4294967294, %s597_s12   ;;  %s597_s12 = sphi %s622_s12, %s756_s12   ;;  %s593_s11 = sphi %s620_s11, %s755_s11   ;;  %s589_s10 = sphi %s618_s10, %s754_s10   ;;  %s585_s9 = sphi %s616_s9, %s753_s9  }
   0x4   : > { %s641_s15 = sadd.s32 1, %s597_s12   ;;  %s69_s16 = sadd.s32 1, %s593_s11 }
   0x5   : > { %s66_s17 = ssub.s32 %s597_s12, %s641_s15  ;;  %p79_p0 = scmp.ne.s32.totalorder %s593_s11, %s589_s10 }
   0x6   : > { %p67_p1 = scmp.eq.s32.totalorder %s66_s17, 0  ;;  %p80_p2 = scmp.eq.s32.totalorder %s637_s13, 1 }
   0x7   : > { %p85_p3 = scmp.ne.s32.totalorder %s589_s10, %s585_s9  ;;  %p86_p4 = scmp.eq.s32.totalorder %s399_s14, 1 }
   0x8   : > { %s652_s18 = scalar_select %p67_p1, %s593_s11, %s69_s16  }
   0x9   : > { %p654_p5 = por %p80_p2, %p79_p0  ;;  %p658_p6 = por %p86_p4, %p85_p3 }
   0xa   : > { %p402_p7 = scmp.ge.s32.totalorder %s597_s12, 1  ;;  %p117_p8 = scmp.lt.s32.totalorder %s597_s12, 3 }
   0xc   : > { %p118_p9 = pnand %p402_p7, %p117_p8 }
   0xd   : > { %s404_s29 = sshll.u32 (!%p118_p9), %s637_s13, 1  ;;  %s137_s17 = sand.u32 (!%p118_p9), 1, %s589_s10  }
   0xe   : > { %121 = sbr.rel (%p118_p9) target bundleno = 192 (0xc0), region = 28  ;;  %p141_p10 = scmp.lt.s32.totalorder (!%p118_p9), %s404_s29, 3 }
   0xf   : > { %s403_s21 = sshll.u32 (!%p118_p9), %s137_s17, 4  ;;  %s493_s22 = sshll.u32 (!%p118_p9), %s637_s13, 4 }
  0x10   : > { %s333_s25 = scalar_lea.hbm (!%p118_p9), %s750_s2, %s493_s22  ;;  %s322_s13 = scalar_lea.sflag (!%p118_p9), [#allocation3], %s137_s17 }
  0x11   : > { %s336_s28 = sshll.u32 (!%p118_p9), %s333_s25, 4  ;;  %s555_s6 = scalar_lea.hbm (!%p118_p9), %s750_s2, 32  ;;  %s337_s28 = int_to_ptr.hbm [resolvable:$true] %s336_s28 }
  0x12   : > { %s549_s30 = sshra.s32 (!%p118_p9), %s337_s28, 4  ;;  %s550_s30 = int_to_ptr.hbm [resolvable:$true] %s549_s30 }
  0x13   : > { %v484_v0 = vld [vmem:[%s749_s1 + $0x38] sm:$0xff]  ;;  %v483_v2 = vld [vmem:[%s749_s1 + $0x30] sm:$0xff]  ;;  %v482_v4 = vld [vmem:[%s749_s1 + $0x28] sm:$0xff]  ;;  %s758_s29 = smov (!%p141_p10, %s404_s29), 3  ;;  %vm318_vm0 = vcmask 523264   ;;  %s551_s3 = scalar_lea.hbm %s550_s30, 16 }
  0x14   : > { %v492_v1 = vld [vmem:[%s749_s1 + $0x78] sm:$0xff]  ;;  %290 = vmatpush.bf16.msra.mxu0 %v484_v0  ;;  %v491_v3 = vld [vmem:[%s749_s1 + $0x70] sm:$0xff]  ;;  %v490_v5 = vld [vmem:[%s749_s1 + $0x68] sm:$0xff]  ;;  %s476_s23 = sshll.u32 %s758_s29, 5  ;;  %p552_p11 = scmp.ne.s32.totalorder %s550_s30, %s551_s3 }
  0x15   : > { %304 = vmatpush.bf16.msra.mxu1 %v492_v1  ;;  %v481_v6 = vld [vmem:[%s749_s1 + $0x20] sm:$0xff]  ;;  %v480_v8 = vld [vmem:[%s749_s1 + $0x18] sm:$0xff]  ;;  %s145_s26 = scalar_lea.vmem %s748_s0, %s476_s23  ;;  %v479_v10 = vld [vmem:[%s749_s1 + $0x10] sm:$0xff]  ;;  %p556_p0 = scmp.lt.s32.totalorder %s550_s30, %s750_s2 }
  0x16   : > { %v489_v7 = vld [vmem:[%s749_s1 + $0x60] sm:$0xff]  ;;  %v488_v9 = vld [vmem:[%s749_s1 + $0x58] sm:$0xff]  ;;  %v487_v11 = vld [vmem:[%s749_s1 + $0x50] sm:$0xff]  ;;  %p553_p12 = pnand %p552_p11, %p654_p5  ;;  %p557_p1 = scmp.lt.s32.totalorder %s555_s6, %s551_s3 }
  0x17   : > { %v478_v12 = vld [vmem:[%s749_s1 + $0x8] sm:$0xff]  ;;  %v148_v14 = vld [vmem:[%s145_s26] sm:$0xff]  ;;  %v152_v16 = vld [vmem:[%s145_s26 + $0x10] sm:$0xff] }
  0x18   : > { %291 = vmatpush.bf16.msra.mxu0 %v483_v2  ;;  %v486_v13 = vld [vmem:[%s749_s1 + $0x48] sm:$0xff]  ;;  %v150_v15 = vld [vmem:[%s145_s26 + $0x20] sm:$0xff]  ;;  %v154_v17 = vld [vmem:[%s145_s26 + $0x30] sm:$0xff]  ;;  %v156_v22 = vadd.f32 %v152_v16, %v148_v14  ;;  %p554_p13 = pneg %p553_p12  ;;  %p558_p2 = por %p557_p1, %p556_p0 }
  0x19   : > { %305 = vmatpush.bf16.msra.mxu1 %v491_v3  ;;  %v149_v18 = vld [vmem:[%s145_s26 + $0x8] sm:$0xff]  ;;  %v153_v20 = vld [vmem:[%s145_s26 + $0x18] sm:$0xff]  ;;  %v158_v23 = vadd.f32 %v154_v17, %v150_v15  ;;  %v477_v26 = vld [vmem:[%s749_s1] sm:$0xff] }
  0x1a   : > { %v151_v19 = vld [vmem:[%s145_s26 + $0x28] sm:$0xff]  ;;  %v155_v21 = vld [vmem:[%s145_s26 + $0x38] sm:$0xff]  ;;  %v157_v24 = vadd.f32 %v153_v20, %v149_v18  ;;  %v485_v27 = vld [vmem:[%s749_s1 + $0x40] sm:$0xff]  ;;  %s139_s26 = scalar_lea.vmem [#allocation2], %s403_s21  ;;  %p559_p3 = pnand %p558_p2, %p554_p13 }
  0x1b   : > { %v159_v25 = vadd.f32 %v155_v21, %v151_v19  ;;  %v160_v28 = vpack.c.bf16 %v158_v23, %v156_v22  ;;  %s334_s27 = sshll.u32 %s139_s26, 4  ;;  %s335_s27 = int_to_ptr.vmem [resolvable:$true] %s334_s27 }
  0x1c   : > { %292 = vmatpush.bf16.msra.mxu0 %v482_v4 }
  0x1d   : > { %306 = vmatpush.bf16.msra.mxu1 %v490_v5  ;;  %v161_v29 = vpack.c.bf16 %v159_v25, %v157_v24 }
  0x20   : > { %293 = vmatpush.bf16.msra.mxu0 %v481_v6 }
  0x21   : > { %307 = vmatpush.bf16.msra.mxu1 %v489_v7 }
  0x24   : > { %294 = vmatpush.bf16.msra.mxu0 %v480_v8 }
  0x25   : > { %308 = vmatpush.bf16.msra.mxu1 %v488_v9 }
  0x28   : > { %295 = vmatpush.bf16.msra.mxu0 %v479_v10 }
  0x29   : > { %309 = vmatpush.bf16.msra.mxu1 %v487_v11 }
  0x2c   : > { %296 = vmatpush.bf16.msra.mxu0 %v478_v12 }
  0x2d   : > { %310 = vmatpush.bf16.msra.mxu1 %v486_v13 }
  0x30   : > { %297 = vmatpush.bf16.msra.mxu0 %v477_v26 }
  0x31   : > { %311 = vmatpush.bf16.msra.mxu1 %v485_v27 }
  0x33   : > { %298 = vmatmul.bf16.vlgmr.msra.gmra.mxu0 %v160_v28 }
  0x34   : > { %312 = vmatmul.bf16.vlgmr.msra.gmra.mxu1 %v161_v29 }
  0xb0   : > { %v299_v30 = vpop.f32.mrf.mxu0 }
  0xb1   : > { %v313_v31 = vpop.f32.mrf.mxu1 }
  0xb2   : > { %v314_v32 = vadd.f32 %v313_v31, %v299_v30 }
  0xb4   : > { %319 = vst.msk [vmem:[%s139_s26] sm:$0xff] %vm318_vm0, %v314_v32 }
  0xb8   : > { %v301_v33 = vpop.f32.mrf.mxu0 }
  0xb9   : > { %v315_v34 = vpop.f32.mrf.mxu1 }
  0xba   : > { %v316_v35 = vadd.f32 %v315_v34, %v301_v33 }
  0xbc   : > { %320 = vst.msk [vmem:[%s139_s26 + $0x8] sm:$0xff] %vm318_vm0, %v316_v35 }
  0xbd   : > { %562 = shalt.err (!%p559_p3)
}
  0xbe   : > { %s599_s8 = smov 128   ;;  %s600_s14 = smov 8  }
  0xbf   : > { %494 = dma.vmem_to_hbm [thread:$0]  (%p654_p5), %s335_s27, 256, %s337_s28, %s322_s13, %s599_s8, %s599_s8, %s600_s14  }
  0xc0 PF: > { %p500_p4 = scmp.ge.s32.totalorder %s597_s12, 2  ;;  %s351_s16 = sand.u32 1, %s585_s9  }
  0xc1   : > { %s352_s17 = scalar_lea.sflag [#allocation3], %s351_s16 }
  0xc2   : > { %p497_p7 = pnand %p500_p4, %p658_p6 }
  0xc4   : > { %p498_p8 = pneg %p497_p7 }
  0xc6   : > { %580 = dma.done.wait (%p498_p8), %s352_s17, 256  }
  0xc7   : > { %582 = vsyncadd (%p498_p8), %s352_s17, 4294967040  ;;  %p12_p9 = scmp.ge.s32.totalorder %s641_s15, 4   ;;  %s753_s9 = smov %s589_s10 }
  0xc8   : > { %s754_s10 = smov %s593_s11  ;;  %s755_s11 = smov %s652_s18 }
  0xc9   : > { %s756_s12 = smov %s641_s15  ;;  %14 = sbr.rel (!%p12_p9) target bundleno = 3 (0x3), region = 63 }
  0xce   :  { %358 = vsyncpa [#allocation3], 1 }
  0xcf   :  { %360 = vsyncpa [#allocation3 + $0x1], 1 }

// kernel: tpu_custom_call.1
= control target key start
LH: loop header
LB: loop body
LE: loop exit
PB: predicated region body
PF: predicated region fallthrough
CT: control target
= control target key end

     0   :  { %7 = vsyncpa [#allocation3], 0  ;;  %s748_s0 = inlined_call_operand.vmem [shape: f32[32,512], index: 0, kind: input, shape index: {}]   ;;  %s749_s1 = inlined_call_operand.vmem [shape: bf16[256,64], index: 1, kind: input, shape index: {}]   ;;  %s750_s2 = inlined_call_operand.hbm [shape: f32[32,64], index: 2, kind: output, shape index: {}]  }
   0x1   :  { %9 = vsyncpa [#allocation3 + $0x1], 0  ;;  %s616_s9 = smov 0   ;;  %s618_s10 = smov 0  }
   0x2   :  { %s620_s11 = smov 0   ;;  %s622_s12 = smov 0  }
   0x3 LB: > { %s637_s13 = sadd.s32 4294967295, %s597_s12   ;;  %s399_s14 = sadd.s32 4294967294, %s597_s12   ;;  %s597_s12 = sphi %s622_s12, %s756_s12   ;;  %s593_s11 = sphi %s620_s11, %s755_s11   ;;  %s589_s10 = sphi %s618_s10, %s754_s10   ;;  %s585_s9 = sphi %s616_s9, %s753_s9  }
   0x4   : > { %s641_s15 = sadd.s32 1, %s597_s12   ;;  %s69_s16 = sadd.s32 1, %s593_s11 }
   0x5   : > { %s66_s17 = ssub.s32 %s597_s12, %s641_s15  ;;  %p79_p0 = scmp.ne.s32.totalorder %s593_s11, %s589_s10 }
   0x6   : > { %p67_p1 = scmp.eq.s32.totalorder %s66_s17, 0  ;;  %p80_p2 = scmp.eq.s32.totalorder %s637_s13, 1 }
   0x7   : > { %p85_p3 = scmp.ne.s32.totalorder %s589_s10, %s585_s9  ;;  %p86_p4 = scmp.eq.s32.totalorder %s399_s14, 1 }
   0x8   : > { %s652_s18 = scalar_select %p67_p1, %s593_s11, %s69_s16  }
   0x9   : > { %p654_p5 = por %p80_p2, %p79_p0  ;;  %p658_p6 = por %p86_p4, %p85_p3 }
   0xa   : > { %p402_p7 = scmp.ge.s32.totalorder %s597_s12, 1  ;;  %p117_p8 = scmp.lt.s32.totalorder %s597_s12, 3 }
   0xc   : > { %p118_p9 = pnand %p402_p7, %p117_p8 }
   0xd   : > { %s404_s29 = sshll.u32 (!%p118_p9), %s637_s13, 1  ;;  %s137_s17 = sand.u32 (!%p118_p9), 1, %s589_s10  }
   0xe   : > { %121 = sbr.rel (%p118_p9) target bundleno = 192 (0xc0), region = 28  ;;  %p141_p10 = scmp.lt.s32.totalorder (!%p118_p9), %s404_s29, 3 }
   0xf   : > { %s403_s21 = sshll.u32 (!%p118_p9), %s137_s17, 4  ;;  %s493_s22 = sshll.u32 (!%p118_p9), %s637_s13, 4 }
  0x10   : > { %s333_s25 = scalar_lea.hbm (!%p118_p9), %s750_s2, %s493_s22  ;;  %s322_s13 = scalar_lea.sflag (!%p118_p9), [#allocation3], %s137_s17 }
  0x11   : > { %s336_s28 = sshll.u32 (!%p118_p9), %s333_s25, 4  ;;  %s555_s6 = scalar_lea.hbm (!%p118_p9), %s750_s2, 32  ;;  %s337_s28 = int_to_ptr.hbm [resolvable:$true] %s336_s28 }
  0x12   : > { %s549_s30 = sshra.s32 (!%p118_p9), %s337_s28, 4  ;;  %s550_s30 = int_to_ptr.hbm [resolvable:$true] %s549_s30 }
  0x13   : > { %v484_v0 = vld [vmem:[%s749_s1 + $0x38] sm:$0xff]  ;;  %v483_v2 = vld [vmem:[%s749_s1 + $0x30] sm:$0xff]  ;;  %v482_v4 = vld [vmem:[%s749_s1 + $0x28] sm:$0xff]  ;;  %s758_s29 = smov (!%p141_p10, %s404_s29), 3  ;;  %vm318_vm0 = vcmask 523264   ;;  %s551_s3 = scalar_lea.hbm %s550_s30, 16 }
  0x14   : > { %v492_v1 = vld [vmem:[%s749_s1 + $0x78] sm:$0xff]  ;;  %290 = vmatpush.bf16.msra.mxu0 %v484_v0  ;;  %v491_v3 = vld [vmem:[%s749_s1 + $0x70] sm:$0xff]  ;;  %v490_v5 = vld [vmem:[%s749_s1 + $0x68] sm:$0xff]  ;;  %s476_s23 = sshll.u32 %s758_s29, 5  ;;  %p552_p11 = scmp.ne.s32.totalorder %s550_s30, %s551_s3 }
  0x15   : > { %304 = vmatpush.bf16.msra.mxu1 %v492_v1  ;;  %v481_v6 = vld [vmem:[%s749_s1 + $0x20] sm:$0xff]  ;;  %v480_v8 = vld [vmem:[%s749_s1 + $0x18] sm:$0xff]  ;;  %s145_s26 = scalar_lea.vmem %s748_s0, %s476_s23  ;;  %v479_v10 = vld [vmem:[%s749_s1 + $0x10] sm:$0xff]  ;;  %p556_p0 = scmp.lt.s32.totalorder %s550_s30, %s750_s2 }
  0x16   : > { %v489_v7 = vld [vmem:[%s749_s1 + $0x60] sm:$0xff]  ;;  %v488_v9 = vld [vmem:[%s749_s1 + $0x58] sm:$0xff]  ;;  %v487_v11 = vld [vmem:[%s749_s1 + $0x50] sm:$0xff]  ;;  %p553_p12 = pnand %p552_p11, %p654_p5  ;;  %p557_p1 = scmp.lt.s32.totalorder %s555_s6, %s551_s3 }
  0x17   : > { %v478_v12 = vld [vmem:[%s749_s1 + $0x8] sm:$0xff]  ;;  %v148_v14 = vld [vmem:[%s145_s26] sm:$0xff]  ;;  %v152_v16 = vld [vmem:[%s145_s26 + $0x10] sm:$0xff] }
  0x18   : > { %291 = vmatpush.bf16.msra.mxu0 %v483_v2  ;;  %v486_v13 = vld [vmem:[%s749_s1 + $0x48] sm:$0xff]  ;;  %v150_v15 = vld [vmem:[%s145_s26 + $0x20] sm:$0xff]  ;;  %v154_v17 = vld [vmem:[%s145_s26 + $0x30] sm:$0xff]  ;;  %v156_v22 = vadd.f32 %v152_v16, %v148_v14  ;;  %p554_p13 = pneg %p553_p12  ;;  %p558_p2 = por %p557_p1, %p556_p0 }
  0x19   : > { %305 = vmatpush.bf16.msra.mxu1 %v491_v3  ;;  %v149_v18 = vld [vmem:[%s145_s26 + $0x8] sm:$0xff]  ;;  %v153_v20 = vld [vmem:[%s145_s26 + $0x18] sm:$0xff]  ;;  %v158_v23 = vadd.f32 %v154_v17, %v150_v15  ;;  %v477_v26 = vld [vmem:[%s749_s1] sm:$0xff] }
  0x1a   : > { %v151_v19 = vld [vmem:[%s145_s26 + $0x28] sm:$0xff]  ;;  %v155_v21 = vld [vmem:[%s145_s26 + $0x38] sm:$0xff]  ;;  %v157_v24 = vadd.f32 %v153_v20, %v149_v18  ;;  %v485_v27 = vld [vmem:[%s749_s1 + $0x40] sm:$0xff]  ;;  %s139_s26 = scalar_lea.vmem [#allocation2], %s403_s21  ;;  %p559_p3 = pnand %p558_p2, %p554_p13 }
  0x1b   : > { %v159_v25 = vadd.f32 %v155_v21, %v151_v19  ;;  %v160_v28 = vpack.c.bf16 %v158_v23, %v156_v22  ;;  %s334_s27 = sshll.u32 %s139_s26, 4  ;;  %s335_s27 = int_to_ptr.vmem [resolvable:$true] %s334_s27 }
  0x1c   : > { %292 = vmatpush.bf16.msra.mxu0 %v482_v4 }
  0x1d   : > { %306 = vmatpush.bf16.msra.mxu1 %v490_v5  ;;  %v161_v29 = vpack.c.bf16 %v159_v25, %v157_v24 }
  0x20   : > { %293 = vmatpush.bf16.msra.mxu0 %v481_v6 }
  0x21   : > { %307 = vmatpush.bf16.msra.mxu1 %v489_v7 }
  0x24   : > { %294 = vmatpush.bf16.msra.mxu0 %v480_v8 }
  0x25   : > { %308 = vmatpush.bf16.msra.mxu1 %v488_v9 }
  0x28   : > { %295 = vmatpush.bf16.msra.mxu0 %v479_v10 }
  0x29   : > { %309 = vmatpush.bf16.msra.mxu1 %v487_v11 }
  0x2c   : > { %296 = vmatpush.bf16.msra.mxu0 %v478_v12 }
  0x2d   : > { %310 = vmatpush.bf16.msra.mxu1 %v486_v13 }
  0x30   : > { %297 = vmatpush.bf16.msra.mxu0 %v477_v26 }
  0x31   : > { %311 = vmatpush.bf16.msra.mxu1 %v485_v27 }
  0x33   : > { %298 = vmatmul.bf16.vlgmr.msra.gmra.mxu0 %v160_v28 }
  0x34   : > { %312 = vmatmul.bf16.vlgmr.msra.gmra.mxu1 %v161_v29 }
  0xb0   : > { %v299_v30 = vpop.f32.mrf.mxu0 }
  0xb1   : > { %v313_v31 = vpop.f32.mrf.mxu1 }
  0xb2   : > { %v314_v32 = vadd.f32 %v313_v31, %v299_v30 }
  0xb4   : > { %319 = vst.msk [vmem:[%s139_s26] sm:$0xff] %vm318_vm0, %v314_v32 }
  0xb8   : > { %v301_v33 = vpop.f32.mrf.mxu0 }
  0xb9   : > { %v315_v34 = vpop.f32.mrf.mxu1 }
  0xba   : > { %v316_v35 = vadd.f32 %v315_v34, %v301_v33 }
  0xbc   : > { %320 = vst.msk [vmem:[%s139_s26 + $0x8] sm:$0xff] %vm318_vm0, %v316_v35 }
  0xbd   : > { %562 = shalt.err (!%p559_p3)
}
  0xbe   : > { %s599_s8 = smov 128   ;;  %s600_s14 = smov 8  }
  0xbf   : > { %494 = dma.vmem_to_hbm [thread:$0]  (%p654_p5), %s335_s27, 256, %s337_s28, %s322_s13, %s599_s8, %s599_s8, %s600_s14  }
  0xc0 PF: > { %p500_p4 = scmp.ge.s32.totalorder %s597_s12, 2  ;;  %s351_s16 = sand.u32 1, %s585_s9  }
  0xc1   : > { %s352_s17 = scalar_lea.sflag [#allocation3], %s351_s16 }
  0xc2   : > { %p497_p7 = pnand %p500_p4, %p658_p6 }
  0xc4   : > { %p498_p8 = pneg %p497_p7 }
  0xc6   : > { %580 = dma.done.wait (%p498_p8), %s352_s17, 256  }
  0xc7   : > { %582 = vsyncadd (%p498_p8), %s352_s17, 4294967040  ;;  %p12_p9 = scmp.ge.s32.totalorder %s641_s15, 4   ;;  %s753_s9 = smov %s589_s10 }
  0xc8   : > { %s754_s10 = smov %s593_s11  ;;  %s755_s11 = smov %s652_s18 }
  0xc9   : > { %s756_s12 = smov %s641_s15  ;;  %14 = sbr.rel (!%p12_p9) target bundleno = 3 (0x3), region = 63 }
  0xce   :  { %358 = vsyncpa [#allocation3], 1 }
  0xcf   :  { %360 = vsyncpa [#allocation3 + $0x1], 1 }

</bundles_post_ra>
